<compile_context>
chip_gen: v5e
topology: v5e:2x2
jax: 0.10.0
libtpu: 0.0.40
codegen_flags: <defaults>
</compile_context>

<pallas_src>
import math

import jax
import jax.numpy as jnp
from jax.experimental import pallas as pl
from jax.experimental.pallas import tpu as pltpu


def _round_up(x, m):
    return ((x + m - 1) // m) * m


def _vmem_limit_bytes():
    """~85% of physical VMEM: ~54 MiB on v7x (64 MiB), ~109 MiB on v5e/v6e."""
    phys = None
    try:
        info = pltpu.get_tpu_info()
        phys = getattr(info, "vmem_capacity_bytes", None)
    except Exception:
        phys = None
    if not phys:
        phys = 64 * 1024 * 1024  # conservative: assume v7x-class 64 MiB
    return int(phys * 0.85)


def _pick_row_tile(M, tm_target):
    """Row tile (multiple of 8) that minimizes padding waste."""
    if M <= tm_target:
        return _round_up(M, 8)
    n_tiles = -(-M // tm_target)
    return _round_up(-(-M // n_tiles), 8)


def _footprint(tm, tn, tk, cs, out_bytes):
    """Per-step VMEM bytes (double-buffered ins/outs + f32 accumulator)."""
    return (2 * tm * tk * cs            # x tile
            + 2 * tk * (2 * tn) * cs    # merged weight tile
            + 2 * (2 * tn) * 4          # merged bias tile (f32)
            + 2 * tm * tn * out_bytes   # output tile
            + tm * (2 * tn) * 4)        # accumulator scratch


def _glu_kernel(x_ref, w_ref, b_ref, o_ref, acc_ref):
    # x_ref: (TM, TK) bf16 | w_ref: (TK, 2*TN) bf16 | b_ref: (1, 2*TN) f32
    # o_ref: (TM, TN)      | acc_ref: (TM, 2*TN) f32
    k = pl.program_id(2)

    @pl.when(k == 0)
    def _():
        acc_ref[...] = jnp.zeros_like(acc_ref)

    acc_ref[...] += jnp.dot(x_ref[...], w_ref[...],
                            preferred_element_type=jnp.float32)

    @pl.when(k == pl.num_programs(2) - 1)
    def _():
        tn = o_ref.shape[-1]
        z = acc_ref[...] + b_ref[...]          # f32 (TM, 2*TN)
        z_a = z[:, :tn]                        # lane-aligned split (tn % 128 == 0)
        z_g = z[:, tn:]
        gate = pl.reciprocal(1.0 + jnp.exp(-z_g), approx=True)  # EUP sigmoid
        o_ref[...] = (z_a * gate).astype(o_ref.dtype)


def gated_linear_unit(x2d, w, b, *, compute_dtype=jnp.bfloat16,
                      tm=None, tn=None, force_pallas=False,
                      vmem_limit_bytes=None):
    """GLU forward.  x2d: (M, K), w: (K, 2H), b: (2H,) -> (M, H)."""
    M, K = x2d.shape
    H = w.shape[1] // 2
    out_dtype = x2d.dtype

    # Tiny problems: one MXU tile + pallas_call overhead cannot beat the fused
    # XLA matmul -> plain XLA unless the Pallas path is explicitly requested.
    if not force_pallas and (M * H * K < 256 * 256 * 256):
        z = x2d @ w + b
        return z[:, :H] * jax.nn.sigmoid(z[:, H:])

    if vmem_limit_bytes is None:
        vmem_limit_bytes = _vmem_limit_bytes()
    usable = int(vmem_limit_bytes * 0.9)   # headroom for second buffers etc.

    cs = jnp.dtype(compute_dtype).itemsize
    out_bytes = jnp.dtype(out_dtype).itemsize

    # Per-generation tile targets (bigger tiles on 128-MiB parts).
    big = usable >= 80 * 1024 * 1024
    tm_t = tm if tm is not None else (512 if big else 256)
    tn_t = tn if tn is not None else (512 if big else 256)
    tn_t = max(128, (tn_t // 128) * 128)

    tm = _pick_row_tile(M, tm_t)
    Mp = _round_up(M, tm)
    tn = min(tn_t, _round_up(H, 128))
    Hp = _round_up(H, tn)

    # K tiling only when a whole-K tile does not fit the VMEM budget.
    if _footprint(tm, tn, K, cs, out_bytes) <= usable:
        tk, Kp = K, K
    else:
        tk = None
        for cand in (2048, 1024, 512, 256, 128):
            if K % cand == 0 and _footprint(tm, tn, cand, cs, out_bytes) <= usable:
                tk = cand
                break
        if tk is None:
            for cand in (2048, 1024, 512, 256, 128):
                if _footprint(tm, tn, cand, cs, out_bytes) <= usable:
                    tk = cand
                    break
        if tk is None:
            tk = 128
        Kp = _round_up(K, tk)

    n_i, n_j, n_k = Mp // tm, Hp // tn, Kp // tk

    # ---- operand preparation (one-time, wrapper side) ----------------------
    if (Mp, Kp) != (M, K):
        x_p = jnp.pad(x2d, ((0, Mp - M), (0, Kp - K)))
    else:
        x_p = x2d
    x_p = x_p.astype(compute_dtype)

    def pad_cols(a, new_c):
        if a.shape[-1] == new_c:
            return a
        return jnp.pad(a, ((0, 0), (0, new_c - a.shape[-1])))

    w_a = pad_cols(w[:, :H], Hp)
    w_g = pad_cols(w[:, H:], Hp)
    b_a = pad_cols(b[:H].reshape(1, H).astype(jnp.float32), Hp)
    b_g = pad_cols(b[H:].reshape(1, H).astype(jnp.float32), Hp)

    # Interleave per tn strip: column block j of the merged weight is
    # [W_a strip j | W_g strip j] (and likewise for the bias).
    w_cat = jnp.concatenate(
        [w_a.reshape(K, n_j, tn), w_g.reshape(K, n_j, tn)], axis=2
    ).reshape(K, 2 * Hp)
    if Kp != K:
        w_cat = jnp.pad(w_cat, ((0, Kp - K), (0, 0)))
    w_cat = w_cat.astype(compute_dtype)
    b_cat = jnp.concatenate(
        [b_a.reshape(1, n_j, tn), b_g.reshape(1, n_j, tn)], axis=2
    ).reshape(1, 2 * Hp)

    # ---- grid order: the larger operand is streamed from HBM exactly once --
    x_bytes = Mp * Kp * cs
    w_bytes = Kp * 2 * Hp * cs
    rows_outer = x_bytes >= w_bytes

    if rows_outer:      # x block index constant across the middle (j) axis
        grid = (n_i, n_j, n_k)
        x_map = lambda i, j, k: (i, k)
        w_map = lambda i, j, k: (k, j)
        b_map = lambda i, j, k: (0, j)
        o_map = lambda i, j, k: (i, j)
    else:               # weight block index constant across the middle (i) axis
        grid = (n_j, n_i, n_k)
        x_map = lambda j, i, k: (i, k)
        w_map = lambda j, i, k: (k, j)
        b_map = lambda j, i, k: (0, j)
        o_map = lambda j, i, k: (i, j)

    out_p = pl.pallas_call(
        _glu_kernel,
        out_shape=jax.ShapeDtypeStruct((Mp, Hp), out_dtype),
        grid_spec=pltpu.PrefetchScalarGridSpec(
            num_scalar_prefetch=0,
            grid=grid,
            in_specs=[
                pl.BlockSpec((tm, tk), x_map),
                pl.BlockSpec((tk, 2 * tn), w_map),
                pl.BlockSpec((1, 2 * tn), b_map),
            ],
            out_specs=pl.BlockSpec((tm, tn), o_map),
            scratch_shapes=[pltpu.VMEM((tm, 2 * tn), jnp.float32)],
        ),
        compiler_params=pltpu.CompilerParams(
            dimension_semantics=("parallel", "parallel", "arbitrary"),
            vmem_limit_bytes=vmem_limit_bytes,
        ),
    )(x_p, w_cat, b_cat)

    return out_p[:M, :H]


def xavier_uniform(key, fan_in, fan_out, dtype=jnp.float32):
    # matches torch.nn.init.xavier_uniform_ (gain=1)
    limit = math.sqrt(6.0 / (fan_in + fan_out))
    return jax.random.uniform(key, (fan_in, fan_out), dtype,
                              minval=-limit, maxval=limit)


if __name__ == "__main__":
    # Module config: input_size=32, hidden_size defaults to input_size,
    # dropout=None, bidirectional_input=False.
    input_size = 32
    hidden_size = 32
    batch, seq = 2, 8

    key = jax.random.PRNGKey(0)
    kx, kw = jax.random.split(key)

    x = jax.random.normal(kx, (batch, seq, input_size), dtype=jnp.float32)

    # Parameters: fc weight xavier-uniform stored as (input_size, 2*hidden)
    # (= transpose of the torch (out, in) layout), bias zeros.
    w = xavier_uniform(kw, input_size, 2 * hidden_size)
    b = jnp.zeros((2 * hidden_size,), dtype=jnp.float32)

    x2d = x.reshape(batch * seq, input_size)
    out2d = gated_linear_unit(x2d, w, b, force_pallas=True)
    out = out2d.reshape(batch, seq, hidden_size)
    jax.block_until_ready(out)

    # Reference 1: bf16-rounded inputs, f32 matmul (matches kernel numerics).
    xb = x2d.astype(jnp.bfloat16).astype(jnp.float32)
    wb = w.astype(jnp.bfloat16).astype(jnp.float32)
    z_b = jnp.dot(xb, wb, precision=jax.lax.Precision.HIGHEST) + b
    ref_b = (z_b[:, :hidden_size] * jax.nn.sigmoid(z_b[:, hidden_size:])
             ).reshape(batch, seq, hidden_size)
    assert jnp.allclose(out, ref_b, atol=5e-3, rtol=5e-3)

    # Reference 2: full f32 reference (loose tolerance for bf16 inputs).
    z_f = jnp.dot(x2d, w, precision=jax.lax.Precision.HIGHEST) + b
    ref_f = (z_f[:, :hidden_size] * jax.nn.sigmoid(z_f[:, hidden_size:])
             ).reshape(batch, seq, hidden_size)
    assert jnp.allclose(out, ref_f, atol=5e-2, rtol=5e-2)

    print("KERNEL_OK")
</pallas_src>

<mosaic_0001>
module attributes {stable_mosaic.version = 11 : i64} {
  func.func @_glu_kernel(%arg0: i32, %arg1: i32, %arg2: i32, %arg3: memref<16x32xbf16, #tpu.memory_space<vmem>>, %arg4: memref<32x256xbf16, #tpu.memory_space<vmem>>, %arg5: memref<1x256xf32, #tpu.memory_space<vmem>>, %arg6: memref<16x128xf32, #tpu.memory_space<vmem>>, %arg7: memref<16x256xf32, #tpu.memory_space<vmem>>) attributes {dimension_semantics = [#tpu.dimension_semantics<parallel>, #tpu.dimension_semantics<parallel>, #tpu.dimension_semantics<arbitrary>], iteration_bounds = array<i64: 1, 1, 1>, scalar_prefetch = 0 : i64, scratch_operands = 1 : i64, tpu.core_type = #tpu.core_type<tc>, window_params = [{transform_indices = @transform_0, window_bounds = array<i64: 16, 32>}, {transform_indices = @transform_1, window_bounds = array<i64: 32, 256>}, {transform_indices = @transform_2, window_bounds = array<i64: 1, 256>}, {transform_indices = @transform_3, window_bounds = array<i64: 16, 128>}]} {
    %c0_i32 = arith.constant 0 : i32
    %0 = arith.cmpi eq, %arg2, %c0_i32 : i32
    %1 = arith.extui %0 : i1 to i32
    %c0_i32_0 = arith.constant 0 : i32
    %2 = arith.cmpi ne, %1, %c0_i32_0 : i32
    scf.if %2 {
      %cst_10 = arith.constant 0.000000e+00 : f32
      %12 = vector.broadcast %cst_10 : f32 to vector<16x256xf32>
      %c0_11 = arith.constant 0 : index
      %c0_12 = arith.constant 0 : index
      %13 = vector.load %arg7[%c0_11, %c0_12] : memref<16x256xf32, #tpu.memory_space<vmem>>, vector<16x256xf32>
      tpu.vector_store %arg7[%c0_11, %c0_12], %12 {strides = array<i32>} : memref<16x256xf32, #tpu.memory_space<vmem>>, vector<16x256xf32>,
    } else {
    }
    %c0 = arith.constant 0 : index
    %c0_1 = arith.constant 0 : index
    %3 = vector.load %arg7[%c0, %c0_1] : memref<16x256xf32, #tpu.memory_space<vmem>>, vector<16x256xf32>
    %c0_2 = arith.constant 0 : index
    %c0_3 = arith.constant 0 : index
    %4 = vector.load %arg3[%c0_2, %c0_3] : memref<16x32xbf16, #tpu.memory_space<vmem>>, vector<16x32xbf16>
    %c0_4 = arith.constant 0 : index
    %c0_5 = arith.constant 0 : index
    %5 = vector.load %arg4[%c0_4, %c0_5] : memref<32x256xbf16, #tpu.memory_space<vmem>>, vector<32x256xbf16>
    %cst = arith.constant dense<0.000000e+00> : vector<16x256xf32>
    %6 = tpu.matmul %4, %5, %cst {dimension_numbers = #tpu.dot_dimension_numbers<[1], [0], [0], [1], [0, 0, 1, 1], [], []>} : vector<16x32xbf16>, vector<32x256xbf16>, vector<16x256xf32> -> vector<16x256xf32>
    %7 = arith.addf %3, %6 : vector<16x256xf32>
    %c0_6 = arith.constant 0 : index
    %c0_7 = arith.constant 0 : index
    %8 = vector.load %arg7[%c0_6, %c0_7] : memref<16x256xf32, #tpu.memory_space<vmem>>, vector<16x256xf32>
    tpu.vector_store %arg7[%c0_6, %c0_7], %7 {strides = array<i32>} : memref<16x256xf32, #tpu.memory_space<vmem>>, vector<16x256xf32>,
    %c0_i32_8 = arith.constant 0 : i32
    %9 = arith.cmpi eq, %arg2, %c0_i32_8 : i32
    %10 = arith.extui %9 : i1 to i32
    %c0_i32_9 = arith.constant 0 : i32
    %11 = arith.cmpi ne, %10, %c0_i32_9 : i32
    scf.if %11 {
      %c0_10 = arith.constant 0 : index
      %c0_11 = arith.constant 0 : index
      %12 = vector.load %arg7[%c0_10, %c0_11] : memref<16x256xf32, #tpu.memory_space<vmem>>, vector<16x256xf32>
      %c0_12 = arith.constant 0 : index
      %c0_13 = arith.constant 0 : index
      %13 = vector.load %arg5[%c0_12, %c0_13] : memref<1x256xf32, #tpu.memory_space<vmem>>, vector<1x256xf32>
      %14 = vector.broadcast %13 : vector<1x256xf32> to vector<16x256xf32>
      %15 = arith.addf %12, %14 : vector<16x256xf32>
      %16 = vector.extract_strided_slice %15 {offsets = [0, 0], sizes = [16, 128], strides = [1, 1]} : vector<16x256xf32> to vector<16x128xf32>
      %17 = vector.extract_strided_slice %15 {offsets = [0, 128], sizes = [16, 128], strides = [1, 1]} : vector<16x256xf32> to vector<16x128xf32>
      %cst_14 = arith.constant 0.000000e+00 : f32
      %18 = vector.broadcast %cst_14 : f32 to vector<16x128xf32>
      %19 = arith.subf %18, %17 : vector<16x128xf32>
      %20 = math.exp %19 : vector<16x128xf32>
      %cst_15 = arith.constant 1.000000e+00 : f32
      %21 = vector.broadcast %cst_15 : f32 to vector<16x128xf32>
      %22 = arith.addf %21, %20 : vector<16x128xf32>
      %23 = tpu.reciprocal %22 {approx = true} : vector<16x128xf32> -> vector<16x128xf32>
      %24 = arith.mulf %16, %23 : vector<16x128xf32>
      %c0_16 = arith.constant 0 : index
      %c0_17 = arith.constant 0 : index
      %25 = vector.load %arg6[%c0_16, %c0_17] : memref<16x128xf32, #tpu.memory_space<vmem>>, vector<16x128xf32>
      tpu.vector_store %arg6[%c0_16, %c0_17], %24 {strides = array<i32>} : memref<16x128xf32, #tpu.memory_space<vmem>>, vector<16x128xf32>,
    } else {
    }
    return
  }
  func.func @transform_0(%arg0: i32, %arg1: i32, %arg2: i32) -> (i32, i32) {
    %c0_i32 = arith.constant 0 : i32
    return %arg1, %arg2 : i32, i32
  }
  func.func @transform_1(%arg0: i32, %arg1: i32, %arg2: i32) -> (i32, i32) {
    %c0_i32 = arith.constant 0 : i32
    return %arg2, %arg0 : i32, i32
  }
  func.func @transform_2(%arg0: i32, %arg1: i32, %arg2: i32) -> (i32, i32) {
    %c0_i32 = arith.constant 0 : i32
    %c0_i32_0 = arith.constant 0 : i32
    return %c0_i32, %arg0 : i32, i32
  }
  func.func @transform_3(%arg0: i32, %arg1: i32, %arg2: i32) -> (i32, i32) {
    %c0_i32 = arith.constant 0 : i32
    return %arg1, %arg0 : i32, i32
  }
}

</mosaic_0001>

<bundles_post_ra>
// kernel: tpu_custom_call.1
= control target key start
LH: loop header
LB: loop body
LE: loop exit
PB: predicated region body
PF: predicated region fallthrough
CT: control target
= control target key end

     0   :  { %8 = vsyncpa [#allocation4], 0  ;;  %s386_s0 = inlined_call_operand.hbm [shape: bf16[16,32], index: 0, kind: input, shape index: {}]   ;;  %s387_s1 = inlined_call_operand.hbm [shape: bf16[32,256], index: 1, kind: input, shape index: {}]   ;;  %s388_s2 = inlined_call_operand.hbm [shape: f32[1,256], index: 2, kind: input, shape index: {}]   ;;  %s389_s3 = inlined_call_operand.hbm [shape: f32[16,128], index: 3, kind: output, shape index: {}]  }
   0x1   :  { %9 = vsyncpa [#allocation7], 0  ;;  %s28_s14 = sshll.u32 %s387_s1, 4  ;;  %s29_s14 = int_to_ptr.hbm [resolvable:$true] %s28_s14 }
   0x2   :  { %10 = vsyncpa [#allocation5], 0  ;;  %s340_s15 = smov [#allocation6]   ;;  %s15_s19 = sshll.u32 %s386_s0, 4  ;;  %s16_s19 = int_to_ptr.hbm [resolvable:$true] %s15_s19 }
   0x3   :  { %s30_s16 = sshll.u32 %s340_s15, 4  ;;  %s341_s20 = smov 128   ;;  %s31_s16 = int_to_ptr.vmem [resolvable:$true] %s30_s16 }
   0x4   :  { %s342_s21 = smov 8   ;;  %s343_s22 = smov [#allocation3]  }
   0x5   :  { %36 = dma.hbm_to_vmem [thread:$0]  %s29_s14, 512, %s31_s16, [#allocation7], %s341_s20, %s341_s20, %s342_s21  }
   0x6   :  { %s17_s23 = sshll.u32 %s343_s22, 4  ;;  %s344_s1 = smov 64   ;;  %s18_s23 = int_to_ptr.vmem [resolvable:$true] %s17_s23 }
   0x7   :  { %s345_s24 = smov 4   ;;  %s42_s27 = sshll.u32 %s388_s2, 4  ;;  %s43_s27 = int_to_ptr.hbm [resolvable:$true] %s42_s27 }
   0x8   :  { %23 = dma.hbm_to_vmem [thread:$0]  %s16_s19, 128, %s18_s23, [#allocation4], %s344_s1, %s344_s1, %s345_s24  }
   0x9   :  { %s346_s28 = smov [#allocation8]  }
   0xa   :  { %s44_s0 = sshll.u32 %s346_s28, 4  ;;  %s45_s0 = int_to_ptr.vmem [resolvable:$true] %s44_s0 }
   0xb   :  { %47 = dma.hbm_to_vmem [thread:$0]  %s43_s27, 32, %s45_s0, [#allocation7]  }
   0xc   :  { %334 = dma.done.wait [#allocation4], 128  }
   0xd   :  { %335 = vsyncadd [#allocation4], 4294967168 }
   0xe   :  { %336 = dma.done.wait [#allocation7], 544  }
   0xf   :  { %337 = vsyncadd [#allocation7], 4294966752  ;;  %v220_v0 = vld [vmem:[#allocation6 + $0x14] sm:$0xf]  ;;  %v211_v1 = vld [vmem:[#allocation6 + $0x18] sm:$0xf0] }
  0x10   :  { %v218_v2 = vld [vmem:[#allocation6 + $0x4] sm:$0xf]  ;;  %v214_v3 = vor.u32 %v220_v0, %v211_v1  ;;  %v203_v4 = vld [vmem:[#allocation6 + $0x8] sm:$0xf0]  ;;  %v209_v5 = vld [vmem:[#allocation6 + $0x10] sm:$0xf] }
  0x11   :  { %v221_v6 = vld [vmem:[#allocation6 + $0x14] sm:$0xf0]  ;;  %v201_v7 = vld [vmem:[#allocation6] sm:$0xf]  ;;  %v219_v8 = vld [vmem:[#allocation6 + $0x4] sm:$0xf0]  ;;  %v206_v9 = vor.u32 %v218_v2, %v203_v4 }
  0x12   :  { %128 = vmatpush.bf16.msra.mxu1 %v214_v3  ;;  %v210_v10 = vor.u32 %v221_v6, %v209_v5  ;;  %v202_v11 = vor.u32 %v219_v8, %v201_v7  ;;  %v217_v12 = vld [vmem:[#allocation3] sm:$0xff]  ;;  %vm104_vm0 = vcmask 261120   ;;  %v151_v13 = vld [vmem:[#allocation8] sm:$0x3]  ;;  %s347_s2 = smov [#allocation9]   ;;  %s181_s5 = sshll.u32 %s389_s3, 4  ;;  %s182_s5 = int_to_ptr.hbm [resolvable:$true] %s181_s5 }
  0x13   :  { %v154_v14 = vperm.slane %v151_v13, 1  ;;  %v153_v25 = vperm.slane %v151_v13, 0  ;;  %s179_s29 = sshll.u32 %s347_s2, 4  ;;  %s180_s29 = int_to_ptr.vmem [resolvable:$true] %s179_s29 }
  0x14   :  { %114 = vmatpush.bf16.msra.mxu0 %v210_v10 }
  0x16   :  { %129 = vmatpush.bf16.msra.mxu1 %v206_v9 }
  0x18   :  { %115 = vmatpush.bf16.msra.mxu0 %v202_v11 }
  0x19   :  { %216 = vmatmul.msk.bf16.vlgmr.msra.gmra.mxu1 %vm104_vm0, %v217_v12 }
  0x1b   :  { %215 = vmatmul.msk.bf16.vlgmr.msra.gmra.mxu0 %vm104_vm0, %v217_v12 }
  0x96   :  { %v131_v15 = vpop.f32.mrf.mxu1 }
  0x97   :  { %v158_v16 = vadd.f32 %v154_v14, %v131_v15 }
  0x98   :  { %v117_v26 = vpop.f32.mrf.mxu0 }
  0x99   :  { %v161_v17 = vsub.f32 0.0, %v158_v16  ;;  %v157_v27 = vadd.f32 %v153_v25, %v117_v26 }
  0x9b   :  { %v163_v18 = vmul.f32 1.442695, %v161_v17 }
  0x9d   :  { %230 = vpow2.f32 %v163_v18 }
  0x9e   :  { %v133_v19 = vpop.f32.mrf.mxu1 }
  0x9f   :  { %v160_v20 = vadd.f32 %v154_v14, %v133_v19 }
  0xa0   :  { %v119_v32 = vpop.f32.mrf.mxu0 }
  0xa1   :  { %v162_v21 = vsub.f32 0.0, %v160_v20  ;;  %v159_v33 = vadd.f32 %v153_v25, %v119_v32 }
  0xa3   :  { %v231_v22 = vpop.eup %230  ;;  %v165_v23 = vmul.f32 1.442695, %v162_v21 }
  0xa4   :  { %v167_v24 = vadd.f32 1.0, %v231_v22 }
  0xa5   :  { %232 = vpow2.f32 %v165_v23 }
  0xa6   :  { %234 = vrcp.f32 %v167_v24 }
  0xab   :  { %v233_v28 = vpop.eup %232 }
  0xac   :  { %v235_v29 = vpop.eup %234  ;;  %v168_v30 = vadd.f32 1.0, %v233_v28 }
  0xad   :  { %v171_v31 = vmul.f32 %v235_v29, %v157_v27 }
  0xae   :  { %236 = vrcp.f32 %v168_v30 }
  0xaf   :  { %173 = vst [vmem:[#allocation9] sm:$0xff] %v171_v31 }
  0xb4   :  { %v237_v34 = vpop.eup %236 }
  0xb5   :  { %v172_v35 = vmul.f32 %v237_v34, %v159_v33 }
  0xb7   :  { %174 = vst [vmem:[#allocation9 + $0x8] sm:$0xff] %v172_v35 }
  0xb8   :  { %187 = dma.vmem_to_hbm [thread:$0]  %s180_s29, 256, %s182_s5, [#allocation5], %s341_s20, %s341_s20, %s342_s21  }
  0xb9   :  { %338 = dma.done.wait [#allocation5], 256  }
  0xba   :  { %339 = vsyncadd [#allocation5], 4294967040 }
  0xbb   :  { %192 = vsyncpa [#allocation4], 1 }
  0xbc   :  { %193 = vsyncpa [#allocation7], 1 }
  0xbd   :  { %194 = vsyncpa [#allocation5], 1 }

</bundles_post_ra>
